<compile_context>
chip_gen: v7x
topology: tpu7x:2x2x1
jax: 0.10.0
libtpu: 0.0.40
codegen_flags: <defaults>
</compile_context>

<pallas_src>
import jax
import jax.numpy as jnp
from jax import lax
from jax.experimental import pallas as pl
from jax.experimental.pallas import tpu as pltpu


NUM_ATOM_TYPES = 8
EMB_DIM = 20            # 20 + 4*3 = 32 first-layer input features
COORD_F = 12            # xc, xv, yc, yv (3 each)
HIDDEN = 32
OUT_DIM = 3
_MASK_BIT = 1 << 16     # mask flag packed into the atom-type stream
_TM_MAX = 16384         # lane tile (multiple of 128); ~4 MiB double-buffered


def _round_up(x, m):
    return ((x + m - 1) // m) * m


# ----------------------------------------------------------------------------
# Pallas kernel: feature-major fused (one-hot embedding + merged-W1) MLP.
#   enc_ref    : (1, TM)  int32   atom_type | (masked << 16)
#   coords_ref : (12, TM) float32 [xc|xv|yc|yv] feature-major
#   emb_w1b_t  : (H, NT)  float32 (embedding @ W1_emb + b1)^T
#   w1c_t      : (H, 12)  float32 W1_coords^T
#   w2_t       : (3, H)   float32 W2^T
#   b2         : (3, 1)   float32
#   out_ref    : (3, TM)  float32 lane-dense output
# ----------------------------------------------------------------------------
def _fused_mlp_kernel(enc_ref, coords_ref, emb_w1b_t_ref, w1c_t_ref,
                      w2_t_ref, b2_ref, out_ref):
    tm = enc_ref.shape[1]
    enc = enc_ref[...]                                           # (1, TM) i32

    # One-hot along sublanes; masked rows (enc >= 2**16) match no type.
    types = lax.broadcasted_iota(jnp.int32, (NUM_ATOM_TYPES, tm), 0)
    onehot = (enc == types).astype(jnp.float32)                  # (NT, TM)

    # h^T = (emb@W1_emb + b1)^T @ onehot  +  W1_coords^T @ coords
    h = jnp.dot(emb_w1b_t_ref[...], onehot,
                preferred_element_type=jnp.float32)              # (H, TM)
    h += jnp.dot(w1c_t_ref[...], coords_ref[...],
                 preferred_element_type=jnp.float32)             # (H, TM)
    h = jnp.maximum(h, 0.0)                                      # ReLU (VPU)

    y = jnp.dot(w2_t_ref[...], h,
                preferred_element_type=jnp.float32) + b2_ref[...]  # (3, TM)

    keep = (enc < _MASK_BIT).astype(jnp.float32)                 # (1, TM)
    out_ref[...] = y * keep                                      # masked -> 0


def _fused_mlp(enc, coords, emb_w1b_t, w1c_t, w2_t, b2, *, tm):
    m = enc.shape[1]
    grid = (m // tm,)

    lane = lambda f: pl.BlockSpec((f, tm), lambda i: (0, i))     # row-tiled
    rep = lambda shape: pl.BlockSpec(shape, lambda i: (0, 0))    # replicated

    flops = 2 * m * (NUM_ATOM_TYPES * HIDDEN + COORD_F * HIDDEN
                     + HIDDEN * OUT_DIM)
    weight_bytes = 4 * (NUM_ATOM_TYPES * HIDDEN + COORD_F * HIDDEN
                        + HIDDEN * OUT_DIM + OUT_DIM)
    bytes_accessed = m * 4 * (1 + COORD_F + OUT_DIM) + weight_bytes

    return pl.pallas_call(
        _fused_mlp_kernel,
        out_shape=jax.ShapeDtypeStruct((OUT_DIM, m), jnp.float32),
        grid=grid,
        in_specs=[
            lane(1),                                  # enc        (1, M) i32
            lane(COORD_F),                            # coords     (12, M) f32
            rep((HIDDEN, NUM_ATOM_TYPES)),            # (emb@W1 + b1)^T
            rep((HIDDEN, COORD_F)),                   # W1_coords^T
            rep((OUT_DIM, HIDDEN)),                   # W2^T
            rep((OUT_DIM, 1)),                        # b2
        ],
        out_specs=lane(OUT_DIM),
        compiler_params=pltpu.CompilerParams(
            dimension_semantics=("parallel",),        # v7x: 2 TCs split tiles
            vmem_limit_bytes=32 * 1024 * 1024),
        cost_estimate=pl.CostEstimate(
            flops=flops, transcendentals=0, bytes_accessed=bytes_accessed),
    )(enc, coords, emb_w1b_t, w1c_t, w2_t, b2)


# ----------------------------------------------------------------------------
# Wrapper mirroring BaseModelWrapper.forward's signature.
# ----------------------------------------------------------------------------
class PallasBaseModelWrapper:
    def __init__(self, key):
        k_emb, k_w1, k_w2 = jax.random.split(key, 3)
        f = EMB_DIM + COORD_F
        self._embedding = jax.random.normal(
            k_emb, (NUM_ATOM_TYPES, EMB_DIM), jnp.float32) * 0.1
        self._w1 = jax.random.normal(k_w1, (f, HIDDEN), jnp.float32) * 0.1
        self.b1 = jnp.zeros((1, HIDDEN), jnp.float32)
        self.w2 = jax.random.normal(k_w2, (HIDDEN, OUT_DIM), jnp.float32) * 0.1
        self.b2 = jnp.zeros((1, OUT_DIM), jnp.float32)

        # Feature-major weights:
        #  * embedding folded through W1's first slice, b1 folded in (each
        #    valid one-hot row sums to 1, so +b1 per type is exact),
        #  * the four coordinate W1 slices merged into one (H, 12) weight.
        self.emb_w1b_t = (self._embedding @ self._w1[:EMB_DIM] + self.b1).T
        self.w1c_t = self._w1[EMB_DIM:].T                  # (H, 12)
        self.w2_t = self.w2.T                              # (3, H)
        self.b2_col = self.b2.T                            # (3, 1)

    def forward(self, atom_types, x_coords, x_velocs, y_coords, y_velocs,
                adj_list, edge_batch_idx, masked_elements, logger=None):
        # TODO(synk): adj_list / edge_batch_idx unused — abstract base defines
        # no graph compute; a concrete subclass would add message passing.
        B, N = atom_types.shape
        M = B * N
        tm = min(_TM_MAX, _round_up(M, 128))
        m_pad = _round_up(M, tm)

        # Pack atom types + mask into one int32 lane stream.
        enc = (atom_types.astype(jnp.int32)
               | (masked_elements.astype(jnp.int32) << 16)).reshape(1, M)

        # Feature-major coordinate slab (12, M): one transpose-pass in HBM.
        coords = jnp.concatenate(
            [x_coords, x_velocs, y_coords, y_velocs], axis=-1)
        coords = coords.reshape(M, COORD_F).astype(jnp.float32).T   # (12, M)

        if m_pad != M:   # pad lanes so every (·, tm) block is in-bounds
            enc = jnp.pad(enc, ((0, 0), (0, m_pad - M)))
            coords = jnp.pad(coords, ((0, 0), (0, m_pad - M)))

        out = _fused_mlp(enc, coords, self.emb_w1b_t, self.w1c_t,
                         self.w2_t, self.b2_col, tm=tm)             # (3, m_pad)
        return out[:, :M].T.reshape(B, N, OUT_DIM)


if __name__ == "__main__":
    key = jax.random.PRNGKey(0)
    k_model, k_at, k_xc, k_xv, k_yc, k_yv = jax.random.split(key, 6)

    B, N = 2, 8                       # batch of 2 systems, 8 atoms each
    model = PallasBaseModelWrapper(k_model)

    atom_types = jax.random.randint(k_at, (B, N), 0, NUM_ATOM_TYPES)
    x_coords = jax.random.normal(k_xc, (B, N, 3), jnp.float32)
    x_velocs = jax.random.normal(k_xv, (B, N, 3), jnp.float32)
    y_coords = jax.random.normal(k_yc, (B, N, 3), jnp.float32)
    y_velocs = jax.random.normal(k_yv, (B, N, 3), jnp.float32)
    # simple ring adjacency per system (unused by the abstract interface)
    src = jnp.arange(N)
    adj_list = jnp.tile(jnp.stack([src, (src + 1) % N], -1)[None], (B, 1, 1))
    edge_batch_idx = jnp.repeat(jnp.arange(B), N)
    masked_elements = jnp.zeros((B, N), jnp.bool_).at[:, -2:].set(True)

    out = model.forward(atom_types, x_coords, x_velocs, y_coords, y_velocs,
                        adj_list, edge_batch_idx, masked_elements)
    jax.block_until_ready(out)

    # --- pure-JAX reference (unfused embedding + concat + MLP) ---------------
    feats = jnp.concatenate(
        [model._embedding[atom_types], x_coords, x_velocs, y_coords, y_velocs],
        axis=-1).reshape(B * N, -1)
    h_ref = jnp.maximum(feats @ model._w1 + model.b1, 0.0)
    y_ref = (h_ref @ model.w2 + model.b2)
    y_ref = y_ref * jnp.logical_not(masked_elements).reshape(B * N, 1)
    y_ref = y_ref.reshape(B, N, OUT_DIM)

    assert out.shape == (B, N, OUT_DIM)
    assert bool(jnp.all(out[:, -2:, :] == 0.0))          # masked atoms exact 0
    assert bool(jnp.allclose(out, y_ref, atol=1e-3, rtol=1e-3))
    print("KERNEL_OK")
</pallas_src>

<mosaic_0001>
module attributes {stable_mosaic.version = 11 : i64} {
  func.func @_fused_mlp_kernel(%arg0: i32, %arg1: memref<1x128xi32, #tpu.memory_space<vmem>>, %arg2: memref<12x128xf32, #tpu.memory_space<vmem>>, %arg3: memref<32x8xf32, #tpu.memory_space<vmem>>, %arg4: memref<32x12xf32, #tpu.memory_space<vmem>>, %arg5: memref<3x32xf32, #tpu.memory_space<vmem>>, %arg6: memref<3x1xf32, #tpu.memory_space<vmem>>, %arg7: memref<3x128xf32, #tpu.memory_space<vmem>>) attributes {dimension_semantics = [#tpu.dimension_semantics<parallel>], iteration_bounds = array<i64: 1>, scalar_prefetch = 0 : i64, scratch_operands = 0 : i64, tpu.core_type = #tpu.core_type<tc>, window_params = [{transform_indices = @transform_0, window_bounds = array<i64: 1, 128>}, {transform_indices = @transform_1, window_bounds = array<i64: 12, 128>}, {pipeline_mode = #tpu.pipeline_mode<synchronous>, transform_indices = @transform_2, window_bounds = array<i64: 32, 8>}, {pipeline_mode = #tpu.pipeline_mode<synchronous>, transform_indices = @transform_3, window_bounds = array<i64: 32, 12>}, {pipeline_mode = #tpu.pipeline_mode<synchronous>, transform_indices = @transform_4, window_bounds = array<i64: 3, 32>}, {pipeline_mode = #tpu.pipeline_mode<synchronous>, transform_indices = @transform_5, window_bounds = array<i64: 3, 1>}, {transform_indices = @transform_6, window_bounds = array<i64: 3, 128>}]} {
    %c0 = arith.constant 0 : index
    %c0_0 = arith.constant 0 : index
    %0 = vector.load %arg1[%c0, %c0_0] : memref<1x128xi32, #tpu.memory_space<vmem>>, vector<1x128xi32>
    %1 = tpu.iota {dimensions = array<i32: 0>} : vector<8x128xi32>
    %2 = vector.broadcast %0 : vector<1x128xi32> to vector<8x128xi32>
    %3 = arith.cmpi eq, %2, %1 : vector<8x128xi32>
    %4 = arith.extui %3 : vector<8x128xi1> to vector<8x128xi32>
    %5 = arith.sitofp %4 : vector<8x128xi32> to vector<8x128xf32>
    %c0_1 = arith.constant 0 : index
    %c0_2 = arith.constant 0 : index
    %6 = vector.load %arg3[%c0_1, %c0_2] : memref<32x8xf32, #tpu.memory_space<vmem>>, vector<32x8xf32>
    %cst = arith.constant dense<0.000000e+00> : vector<32x128xf32>
    %7 = tpu.matmul %6, %5, %cst {dimension_numbers = #tpu.dot_dimension_numbers<[1], [0], [0], [1], [0, 0, 1, 1], [], []>} : vector<32x8xf32>, vector<8x128xf32>, vector<32x128xf32> -> vector<32x128xf32>
    %c0_3 = arith.constant 0 : index
    %c0_4 = arith.constant 0 : index
    %8 = vector.load %arg4[%c0_3, %c0_4] : memref<32x12xf32, #tpu.memory_space<vmem>>, vector<32x12xf32>
    %c0_5 = arith.constant 0 : index
    %c0_6 = arith.constant 0 : index
    %9 = vector.load %arg2[%c0_5, %c0_6] : memref<12x128xf32, #tpu.memory_space<vmem>>, vector<12x128xf32>
    %cst_7 = arith.constant dense<0.000000e+00> : vector<32x128xf32>
    %10 = tpu.matmul %8, %9, %cst_7 {dimension_numbers = #tpu.dot_dimension_numbers<[1], [0], [0], [1], [0, 0, 1, 1], [], []>} : vector<32x12xf32>, vector<12x128xf32>, vector<32x128xf32> -> vector<32x128xf32>
    %11 = arith.addf %7, %10 : vector<32x128xf32>
    %cst_8 = arith.constant 0.000000e+00 : f32
    %12 = vector.broadcast %cst_8 : f32 to vector<32x128xf32>
    %13 = arith.maximumf %11, %12 : vector<32x128xf32>
    %c0_9 = arith.constant 0 : index
    %c0_10 = arith.constant 0 : index
    %14 = vector.load %arg5[%c0_9, %c0_10] : memref<3x32xf32, #tpu.memory_space<vmem>>, vector<3x32xf32>
    %cst_11 = arith.constant dense<0.000000e+00> : vector<3x128xf32>
    %15 = tpu.matmul %14, %13, %cst_11 {dimension_numbers = #tpu.dot_dimension_numbers<[1], [0], [0], [1], [0, 0, 1, 1], [], []>} : vector<3x32xf32>, vector<32x128xf32>, vector<3x128xf32> -> vector<3x128xf32>
    %c0_12 = arith.constant 0 : index
    %c0_13 = arith.constant 0 : index
    %16 = vector.load %arg6[%c0_12, %c0_13] : memref<3x1xf32, #tpu.memory_space<vmem>>, vector<3x1xf32>
    %17 = vector.broadcast %16 : vector<3x1xf32> to vector<3x128xf32>
    %18 = arith.addf %15, %17 : vector<3x128xf32>
    %c65536_i32 = arith.constant 65536 : i32
    %19 = vector.broadcast %c65536_i32 : i32 to vector<1x128xi32>
    %20 = arith.cmpi slt, %0, %19 : vector<1x128xi32>
    %21 = arith.extui %20 : vector<1x128xi1> to vector<1x128xi32>
    %22 = arith.sitofp %21 : vector<1x128xi32> to vector<1x128xf32>
    %23 = vector.broadcast %22 : vector<1x128xf32> to vector<3x128xf32>
    %24 = arith.mulf %18, %23 : vector<3x128xf32>
    %c0_14 = arith.constant 0 : index
    %c0_15 = arith.constant 0 : index
    %25 = vector.load %arg7[%c0_14, %c0_15] : memref<3x128xf32, #tpu.memory_space<vmem>>, vector<3x128xf32>
    tpu.vector_store %arg7[%c0_14, %c0_15], %24 {strides = array<i32>} : memref<3x128xf32, #tpu.memory_space<vmem>>, vector<3x128xf32>,
    return
  }
  func.func @transform_0(%arg0: i32) -> (i32, i32) {
    %c0_i32 = arith.constant 0 : i32
    %c0_i32_0 = arith.constant 0 : i32
    return %c0_i32, %arg0 : i32, i32
  }
  func.func @transform_1(%arg0: i32) -> (i32, i32) {
    %c0_i32 = arith.constant 0 : i32
    %c0_i32_0 = arith.constant 0 : i32
    return %c0_i32, %arg0 : i32, i32
  }
  func.func @transform_2(%arg0: i32) -> (i32, i32) {
    %c0_i32 = arith.constant 0 : i32
    %c0_i32_0 = arith.constant 0 : i32
    %c0_i32_1 = arith.constant 0 : i32
    return %c0_i32, %c0_i32_0 : i32, i32
  }
  func.func @transform_3(%arg0: i32) -> (i32, i32) {
    %c0_i32 = arith.constant 0 : i32
    %c0_i32_0 = arith.constant 0 : i32
    %c0_i32_1 = arith.constant 0 : i32
    return %c0_i32, %c0_i32_0 : i32, i32
  }
  func.func @transform_4(%arg0: i32) -> (i32, i32) {
    %c0_i32 = arith.constant 0 : i32
    %c0_i32_0 = arith.constant 0 : i32
    %c0_i32_1 = arith.constant 0 : i32
    return %c0_i32, %c0_i32_0 : i32, i32
  }
  func.func @transform_5(%arg0: i32) -> (i32, i32) {
    %c0_i32 = arith.constant 0 : i32
    %c0_i32_0 = arith.constant 0 : i32
    %c0_i32_1 = arith.constant 0 : i32
    return %c0_i32, %c0_i32_0 : i32, i32
  }
  func.func @transform_6(%arg0: i32) -> (i32, i32) {
    %c0_i32 = arith.constant 0 : i32
    %c0_i32_0 = arith.constant 0 : i32
    return %c0_i32, %arg0 : i32, i32
  }
}

</mosaic_0001>

<bundles_post_ra>
// kernel: tpu_custom_call.1
= control target key start
LH: loop header
LB: loop body
LE: loop exit
PB: predicated region body
PF: predicated region fallthrough
CT: control target
= control target key end

     0   :  { %vm57_vm0 = vcmask 1043456   ;;  %v25_v3 = vlaneseq  ;;  %vm460_vm1 = vmmov 1   ;;  %vm44_vm3 = vcmask 97280   ;;  %s561_s0 = inlined_call_operand.vmem [shape: s32[1,128], index: 0, kind: input, shape index: {}]   ;;  %s562_s1 = inlined_call_operand.vmem [shape: f32[12,128], index: 1, kind: input, shape index: {}]   ;;  %s563_s2 = inlined_call_operand.vmem [shape: f32[32,8], index: 2, kind: input, shape index: {}]   ;;  %s564_s3 = inlined_call_operand.vmem [shape: f32[32,12], index: 3, kind: input, shape index: {}]   ;;  %s565_s4 = inlined_call_operand.vmem [shape: f32[3,32], index: 4, kind: input, shape index: {}]   ;;  %s566_s5 = inlined_call_operand.vmem [shape: f32[3,1], index: 5, kind: input, shape index: {}]   ;;  %s567_s6 = inlined_call_operand.hbm [shape: f32[3,128], index: 6, kind: output, shape index: {}]  }
   0x1   :  { %v42_v0 = vld [vmem:[%s562_s1] sm:$0xff]  ;;  %v43_v1 = vld [vmem:[%s562_s1 + $0x8] sm:$0xf]  ;;  %vm413_vm2 = vmpackc.low %vm57_vm0, %vm460_vm1  ;;  %vm146_vm4 = vcmask 64512  }
   0x2   :  { %v38_v2 = vld [vmem:[%s564_s3] sm:$0xff]  ;;  %v412_v4 = vpack.c.bf16 %v43_v1, %v42_v0  ;;  %v26_v5 = vshrl.u32 %v25_v3, 7  ;;  %v39_v9 = vld [vmem:[%s564_s3 + $0x8] sm:$0xff] }
   0x3   :  { %387 = vmatprep.mubr.msk.f32.mxu0 %vm44_vm3, %v38_v2  ;;  %v34_v6 = vld [vmem:[%s563_s2] sm:$0xff] }
   0x4   :  { %414 = vmatprep.subr.msk.bf16.mxu0 %vm413_vm2, %v412_v4  ;;  %v24_v7 = vld [vmem:[%s561_s0] sm:$0x1]  ;;  %395 = vmatprep.mubr.msk.f32.mxu1 %vm146_vm4, %v34_v6  ;;  %v29_v8 = vsub.s32 0, %v26_v5 }
   0x5   :  { %417 = vmatpush3.bf16.msk.msra.mxu0 %vm413_vm2, %v412_v4 }
   0x6   :  { %11 = vsyncpa [#allocation3], 0  ;;  %v40_v10 = vld [vmem:[%s564_s3 + $0x10] sm:$0xff]  ;;  %v30_v11 = vrot.slane %v24_v7, %v29_v8  ;;  %v35_v12 = vld [vmem:[%s563_s2 + $0x8] sm:$0xff]  ;;  %v461_v14 = vmov 1.0   ;;  %v462_v17 = vmov 0.0|0.0  }
   0x7   :  { %v41_v13 = vld [vmem:[%s564_s3 + $0x18] sm:$0xff]  ;;  %v36_v15 = vld [vmem:[%s563_s2 + $0x10] sm:$0xff]  ;;  %vm329_vm6 = vcmp.lt.s32.totalorder %v24_v7, 65536  ;;  %vm463_vm7 = vmmov 0   ;;  %v464_v18 = vmov 0.0   ;;  %v465_v21 = vmov 0  }
   0x8   :  { %388 = vmatmul.mubr.msk.f32.vlgmr.msra.gmra.mrb[0].mxu0 %vm44_vm3, %v39_v9  ;;  %vm31_vm5 = vcmp.eq.s32.totalorder %v30_v11, %v26_v5  ;;  %v37_v16 = vld [vmem:[%s563_s2 + $0x18] sm:$0xff]  ;;  %v366_v19 = vsel %vm329_vm6, 1.0, %v464_v18  ;;  %v249_v20 = vld [vmem:[%s566_s5] sm:$0x7]  ;;  %435 = vset.pattern.permute.xlu0 %v465_v21  ;;  %vm255_vm8 = vcmask 261120   ;;  %s466_s18 = smov [#allocation2]  }
   0x9   :  { %390 = vmatprep.mubr.msk.f32.mxu0 %vm44_vm3, %v40_v10  ;;  %393 = vmatprep.subr.msk.mxu1 %vm31_vm5, %v461_v14  ;;  %v248_v40 = vld [vmem:[%s565_s4] sm:$0x7]  ;;  %v336_v42 = vrot.slane %v366_v19, %v29_v8  ;;  %s346_s19 = sshll.u32 %s466_s18, 4  ;;  %s347_s19 = int_to_ptr.vmem [resolvable:$true] %s346_s19 }
   0xa   :  { %394 = vmatpush3.msk.msra.mxu1 %vm31_vm5, %v461_v14  ;;  %252 = vperm.xlu0 %435, %v249_v20   ;;  %s436_s20 = scalar_lea.vmem %s347_s19, 64  ;;  %p441_p1 = scmp.lt.s32.totalorder %s347_s19, %s347_s19 }
   0xb   :  { %396 = vmatmul.mubr.msk.f32.vlgmr.msra.gmra.mrb[0].mxu1 %vm146_vm4, %v35_v12  ;;  %418 = vmatprep.subr.bf16.mxu1 %v462_v17  ;;  %p437_p0 = scmp.ne.s32.totalorder %s347_s19, %s436_s20  ;;  %p442_p2 = scmp.lt.s32.totalorder %s436_s20, %s436_s20 }
   0xc   :  { %391 = vmatmul.mubr.msk.f32.gmra.mrb[2].mxu0 %vm44_vm3, %v41_v13  ;;  %398 = vmatprep.mubr.msk.f32.mxu1 %vm146_vm4, %v36_v15 }
   0xd   :  { %p443_p3 = por %p442_p2, %p441_p1 }
   0xf   :  { %399 = vmatmul.mubr.msk.f32.gmra.mrb[2].mxu1 %vm146_vm4, %v37_v16  ;;  %p444_p4 = pnand %p443_p3, %p437_p0 }
  0x10   :  { %409 = vmatprep.mubr.msk.f32.mxu1 %vm463_vm7, %v464_v18 }
  0x89   :  { %v253_v41 = vpop.permute.xlu0 %252 }
  0xdb   :  { %v389_v22 = vpop.f32.mrb[0].mxu0 }
  0xdc   :  { %v127_v23 = vpop.f32.mrb[1].mxu0 }
  0xde   :  { %v397_v24 = vpop.f32.mrb[0].mxu1 }
  0xdf   :  { %v392_v25 = vpop.f32.mrb[2].mxu0  ;;  %v231_v26 = vadd.f32 %v397_v24, %v389_v22  ;;  %v225_v27 = vpop.f32.mrb[1].mxu1 }
  0xe0   :  { %v137_v28 = vpop.f32.mrb[3].mxu0  ;;  %v226_v29 = vadd.f32 %v225_v27, %v127_v23 }
  0xe1   :  { %v245_v30 = vmax.f32 %v231_v26, 0.0 }
  0xe2   :  { %v244_v31 = vmax.f32 %v226_v29, 0.0  ;;  %v400_v32 = vpop.f32.mrb[2].mxu1 }
  0xe3   :  { %v241_v33 = vadd.f32 %v400_v32, %v392_v25  ;;  %v235_v34 = vpop.f32.mrb[3].mxu1 }
  0xe4   :  { %v419_v35 = vpack.c.bf16 %v245_v30, %v244_v31  ;;  %v236_v36 = vadd.f32 %v235_v34, %v137_v28 }
  0xe5   :  { %v247_v37 = vmax.f32 %v241_v33, 0.0 }
  0xe6   :  { %v246_v38 = vmax.f32 %v236_v36, 0.0  ;;  %420 = vmatpush3.bf16.msra.mxu1 %v419_v35 }
  0xe7   :  { %421 = vmatprep.subr.bf16.mxu1 %v462_v17 }
  0xe8   :  { %v422_v39 = vpack.c.bf16 %v247_v37, %v246_v38 }
  0xea   :  { %423 = vmatpush3.bf16.msra.mxu1 %v422_v39 }
  0xed   :  { %410 = vmatmul.mubr.msk.f32.vlgmr.msra.gmra.mrb[4].mxu1 %vm255_vm8, %v248_v40 }
 0x1c0   :  { %v325_v43 = vpop.f32.mrb[4].mxu1 }
 0x1c1   :  { %v326_v44 = vadd.f32 %v325_v43, %v253_v41  ;;  %v411_v45 = vpop.f32.mrb[5].mxu1 }
 0x1c3   :  { %v338_v46 = vmul.f32 %v336_v42, %v326_v44 }
 0x1c5   :  { %339 = vst [vmem:[#allocation2] sm:$0x7] %v338_v46 }
 0x1c6   :  { %447 = shalt.err (!%p444_p4)
}
 0x1c7   :  { %s448_s22 = scalar_lea.hbm %s567_s6, 64 }
 0x1c8   :  { %p449_p5 = scmp.ne.s32.totalorder %s567_s6, %s448_s22  ;;  %p452_p6 = scmp.lt.u32.totalorder %s448_s22, %s567_s6 }
 0x1ca   :  { %p454_p7 = pnand %p452_p6, %p449_p5 }
 0x1cc   :  { %457 = shalt.err (!%p454_p7)
}
 0x1cd   :  { %349 = dma.vmem_to_hbm [thread:$0]  %s347_s19, 64, %s567_s6, [#allocation3]  }
 0x1ce   :  { %458 = dma.done.wait [#allocation3], 64  }
 0x1cf   :  { %459 = vsyncadd [#allocation3], 4294967232 }
 0x1d0   :  { %353 = vsyncpa [#allocation3], 1 }

</bundles_post_ra>
